<compile_context>
chip_gen: v6e
topology: v6e:2x2x1
jax: 0.10.0
libtpu: 0.0.40
codegen_flags: <defaults>
</compile_context>

<pallas_src>
import jax
import jax.numpy as jnp
from jax.experimental import pallas as pl
from jax.experimental.pallas import tpu as pltpu


def logits_to_predicate_kernel(xT_ref, wT_ref, b_ref, d_ref, o_ref):
    # xT_ref: [H, TB]   wT_ref: [C, H]   b_ref: [C, 1]   d_ref: [1, TB]
    # o_ref:  [1, TB]
    #
    # ---- logits model (linear head) on the MXU, class-major layout ----
    # logits_T[c, j] = sum_h W[h, c] * x[j, h] + b[c]
    logits = jnp.dot(wT_ref[...], xT_ref[...],
                     preferred_element_type=jnp.float32) + b_ref[...]   # [C, TB]

    # ---- numerically stable softmax over the class (sublane) axis ----
    m = jnp.max(logits, axis=0, keepdims=True)          # [1, TB]
    e = jnp.exp(logits - m)                              # [C, TB]
    den = jnp.sum(e, axis=0, keepdims=True)              # [1, TB]

    # ---- gather(probs, 1, d) fused: one-hot mask on the un-normalized exp ----
    C, TB = e.shape
    cls_ids = jax.lax.broadcasted_iota(jnp.int32, (C, TB), 0)
    num = jnp.sum(jnp.where(cls_ids == d_ref[...], e, 0.0),
                  axis=0, keepdims=True)                 # [1, TB]

    # Single reciprocal per example on the EUP (separate VLIW slot) instead of
    # a full [C, TB] VPU divide.
    o_ref[...] = num * pl.reciprocal(den, approx=True)   # [1, TB], lane-dense


def logits_to_predicate(x, w, b, d, *, tb=128):
    """x: [B, H] f32, w: [H, C] f32, b: [1, C] f32, d: [B, 1] int -> [B, 1] f32."""
    B, H = x.shape
    C = w.shape[1]

    # Wrapper-side layout plumbing: present a lane-dense (batch-on-lanes) slab
    # to the kernel.  These transposes/reshapes are pure layout, not compute.
    x_t = x.T                                   # [H, B]
    w_t = w.T                                   # [C, H]
    b_col = b.reshape(C, 1)                     # [C, 1]
    d_row = d.reshape(1, B).astype(jnp.int32)   # [1, B]

    grid = (pl.cdiv(B, tb),)

    out_row = pl.pallas_call(
        logits_to_predicate_kernel,
        out_shape=jax.ShapeDtypeStruct((1, B), jnp.float32),
        grid=grid,
        in_specs=[
            # x tile streams over the batch (lane) axis.
            pl.BlockSpec((H, tb), lambda i: (0, i)),
            # Weights / bias: same block every step -> stay VMEM-resident.
            pl.BlockSpec((C, H), lambda i: (0, 0)),
            pl.BlockSpec((C, 1), lambda i: (0, 0)),
            # Class index, lane-dense.
            pl.BlockSpec((1, tb), lambda i: (0, i)),
        ],
        out_specs=pl.BlockSpec((1, tb), lambda i: (0, i)),
        compiler_params=pltpu.CompilerParams(
            # Batch tiles are independent -> megacore split on v7x.
            dimension_semantics=("parallel",),
        ),
    )(x_t, w_t, b_col, d_row)

    return out_row.reshape(B, 1)


if __name__ == "__main__":
    # Small but tiling-friendly shapes: B multiple of TB=128, batch on lanes.
    B, H, C = 256, 64, 16
    TB = 128

    key = jax.random.PRNGKey(0)
    kx, kw, kb, kd = jax.random.split(key, 4)

    x = jax.random.normal(kx, (B, H), dtype=jnp.float32)
    w = jax.random.normal(kw, (H, C), dtype=jnp.float32) * 0.1   # linear "logits_model" weights
    b = jax.random.normal(kb, (1, C), dtype=jnp.float32) * 0.01  # bias
    d = jax.random.randint(kd, (B, 1), 0, C, dtype=jnp.int32)    # class label per example

    # TODO(synk): the PyTorch module wraps an *arbitrary* logits_model; only a
    # linear logits head is fused here (other architectures would need their
    # own kernels feeding the same softmax+gather epilogue).

    out = logits_to_predicate(x, w, b, d, tb=TB)
    out = jax.block_until_ready(out)

    # Pure-JAX reference (torch semantics: softmax(dim=1) then gather(dim=1, d)).
    logits_ref = x @ w + b
    probs_ref = jax.nn.softmax(logits_ref, axis=1)
    ref = jnp.take_along_axis(probs_ref, d, axis=1)

    assert out.shape == (B, 1), out.shape
    # Slightly relaxed tolerance for the EUP approximate reciprocal.
    assert jnp.allclose(out, ref, atol=2e-3, rtol=2e-3), (out, ref)

    print("KERNEL_OK")
</pallas_src>

<mosaic_0001>
module attributes {stable_mosaic.version = 11 : i64} {
  func.func @logits_to_predicate_kernel(%arg0: i32, %arg1: memref<64x128xf32, #tpu.memory_space<vmem>>, %arg2: memref<16x64xf32, #tpu.memory_space<vmem>>, %arg3: memref<16x1xf32, #tpu.memory_space<vmem>>, %arg4: memref<1x128xi32, #tpu.memory_space<vmem>>, %arg5: memref<1x128xf32, #tpu.memory_space<vmem>>) attributes {dimension_semantics = [#tpu.dimension_semantics<parallel>], iteration_bounds = array<i64: 2>, scalar_prefetch = 0 : i64, scratch_operands = 0 : i64, tpu.core_type = #tpu.core_type<tc>, window_params = [{transform_indices = @transform_0, window_bounds = array<i64: 64, 128>}, {pipeline_mode = #tpu.pipeline_mode<synchronous>, transform_indices = @transform_1, window_bounds = array<i64: 16, 64>}, {pipeline_mode = #tpu.pipeline_mode<synchronous>, transform_indices = @transform_2, window_bounds = array<i64: 16, 1>}, {transform_indices = @transform_3, window_bounds = array<i64: 1, 128>}, {transform_indices = @transform_4, window_bounds = array<i64: 1, 128>}]} {
    %c0 = arith.constant 0 : index
    %c0_0 = arith.constant 0 : index
    %0 = vector.load %arg2[%c0, %c0_0] : memref<16x64xf32, #tpu.memory_space<vmem>>, vector<16x64xf32>
    %c0_1 = arith.constant 0 : index
    %c0_2 = arith.constant 0 : index
    %1 = vector.load %arg1[%c0_1, %c0_2] : memref<64x128xf32, #tpu.memory_space<vmem>>, vector<64x128xf32>
    %cst = arith.constant dense<0.000000e+00> : vector<16x128xf32>
    %2 = tpu.matmul %0, %1, %cst {dimension_numbers = #tpu.dot_dimension_numbers<[1], [0], [0], [1], [0, 0, 1, 1], [], []>} : vector<16x64xf32>, vector<64x128xf32>, vector<16x128xf32> -> vector<16x128xf32>
    %c0_3 = arith.constant 0 : index
    %c0_4 = arith.constant 0 : index
    %3 = vector.load %arg3[%c0_3, %c0_4] : memref<16x1xf32, #tpu.memory_space<vmem>>, vector<16x1xf32>
    %4 = vector.broadcast %3 : vector<16x1xf32> to vector<16x128xf32>
    %5 = arith.addf %2, %4 : vector<16x128xf32>
    %cst_5 = arith.constant dense<0xFF800000> : vector<128xf32>
    %6 = vector.multi_reduction <maximumf>, %5, %cst_5 [0] : vector<16x128xf32> to vector<128xf32>
    %7 = vector.shape_cast %6 : vector<128xf32> to vector<1x128xf32>
    %8 = vector.broadcast %7 : vector<1x128xf32> to vector<16x128xf32>
    %9 = arith.subf %5, %8 : vector<16x128xf32>
    %10 = math.exp %9 : vector<16x128xf32>
    %cst_6 = arith.constant dense<0.000000e+00> : vector<128xf32>
    %11 = vector.multi_reduction <add>, %10, %cst_6 [0] : vector<16x128xf32> to vector<128xf32>
    %12 = vector.shape_cast %11 : vector<128xf32> to vector<1x128xf32>
    %13 = tpu.iota {dimensions = array<i32: 0>} : vector<16x128xi32>
    %c0_7 = arith.constant 0 : index
    %c0_8 = arith.constant 0 : index
    %14 = vector.load %arg4[%c0_7, %c0_8] : memref<1x128xi32, #tpu.memory_space<vmem>>, vector<1x128xi32>
    %15 = vector.broadcast %14 : vector<1x128xi32> to vector<16x128xi32>
    %16 = arith.cmpi eq, %13, %15 : vector<16x128xi32>
    %cst_9 = arith.constant 0.000000e+00 : f32
    %17 = vector.broadcast %cst_9 : f32 to vector<16x128xf32>
    %18 = arith.select %16, %10, %17 : vector<16x128xi1>, vector<16x128xf32>
    %cst_10 = arith.constant dense<0.000000e+00> : vector<128xf32>
    %19 = vector.multi_reduction <add>, %18, %cst_10 [0] : vector<16x128xf32> to vector<128xf32>
    %20 = vector.shape_cast %19 : vector<128xf32> to vector<1x128xf32>
    %21 = tpu.reciprocal %12 {approx = true} : vector<1x128xf32> -> vector<1x128xf32>
    %22 = arith.mulf %20, %21 : vector<1x128xf32>
    %c0_11 = arith.constant 0 : index
    %c0_12 = arith.constant 0 : index
    %23 = vector.load %arg5[%c0_11, %c0_12] : memref<1x128xf32, #tpu.memory_space<vmem>>, vector<1x128xf32>
    tpu.vector_store %arg5[%c0_11, %c0_12], %22 {strides = array<i32>} : memref<1x128xf32, #tpu.memory_space<vmem>>, vector<1x128xf32>,
    return
  }
  func.func @transform_0(%arg0: i32) -> (i32, i32) {
    %c0_i32 = arith.constant 0 : i32
    %c0_i32_0 = arith.constant 0 : i32
    return %c0_i32, %arg0 : i32, i32
  }
  func.func @transform_1(%arg0: i32) -> (i32, i32) {
    %c0_i32 = arith.constant 0 : i32
    %c0_i32_0 = arith.constant 0 : i32
    %c0_i32_1 = arith.constant 0 : i32
    return %c0_i32, %c0_i32_0 : i32, i32
  }
  func.func @transform_2(%arg0: i32) -> (i32, i32) {
    %c0_i32 = arith.constant 0 : i32
    %c0_i32_0 = arith.constant 0 : i32
    %c0_i32_1 = arith.constant 0 : i32
    return %c0_i32, %c0_i32_0 : i32, i32
  }
  func.func @transform_3(%arg0: i32) -> (i32, i32) {
    %c0_i32 = arith.constant 0 : i32
    %c0_i32_0 = arith.constant 0 : i32
    return %c0_i32, %arg0 : i32, i32
  }
  func.func @transform_4(%arg0: i32) -> (i32, i32) {
    %c0_i32 = arith.constant 0 : i32
    %c0_i32_0 = arith.constant 0 : i32
    return %c0_i32, %arg0 : i32, i32
  }
}

</mosaic_0001>

<bundles_post_ra>
// kernel: tpu_custom_call.1
= control target key start
LH: loop header
LB: loop body
LE: loop exit
PB: predicated region body
PF: predicated region fallthrough
CT: control target
= control target key end

     0   :  { %9 = vsyncpa [#allocation3], 0  ;;  %s858_s0 = inlined_call_operand.hbm [shape: f32[64,256], index: 0, kind: input, shape index: {}]   ;;  %s859_s1 = inlined_call_operand.vmem [shape: f32[16,64], index: 1, kind: input, shape index: {}]   ;;  %s860_s2 = inlined_call_operand.vmem [shape: f32[16,1], index: 2, kind: input, shape index: {}]   ;;  %s861_s3 = inlined_call_operand.vmem [shape: s32[1,256], index: 3, kind: input, shape index: {}]   ;;  %s862_s4 = inlined_call_operand.hbm [shape: f32[1,256], index: 4, kind: output, shape index: {}]  }
   0x1   :  { %11 = vsyncpa [#allocation3 + $0x1], 0 }
   0x2   :  { %12 = vsyncpa [#allocation4], 0 }
   0x3   :  { %14 = vsyncpa [#allocation4 + $0x1], 0  ;;  %s686_s15 = smov 0   ;;  %s688_s16 = smov 0  }
   0x4   :  { %s690_s17 = smov 0   ;;  %s692_s18 = smov 0  }
   0x5 LB: > { %s707_s19 = sadd.s32 4294967295, %s653_s18   ;;  %s462_s20 = sadd.s32 4294967294, %s653_s18   ;;  %s653_s18 = sphi %s692_s18, %s878_s18   ;;  %s649_s17 = sphi %s690_s17, %s877_s17   ;;  %s645_s16 = sphi %s688_s16, %s876_s16   ;;  %s641_s15 = sphi %s686_s15, %s875_s15  }
   0x6   : > { %s711_s21 = sadd.s32 1, %s653_s18   ;;  %s27_s22 = sadd.s32 1, %s649_s17 }
   0x7   : > { %s24_s23 = ssub.s32 %s653_s18, %s711_s21  ;;  %p34_p0 = scmp.ne.s32.totalorder %s649_s17, %s645_s16 }
   0x8   : > { %p25_p1 = scmp.eq.s32.totalorder %s24_s23, 0  ;;  %p35_p2 = scmp.eq.s32.totalorder %s653_s18, 0 }
   0x9   : > { %p40_p3 = scmp.ne.s32.totalorder %s645_s16, %s641_s15  ;;  %p41_p4 = scmp.eq.s32.totalorder %s707_s19, 0 }
   0xa   : > { %s723_s24 = scalar_select %p25_p1, %s649_s17, %s27_s22  }
   0xb   : > { %p725_p5 = por %p35_p2, %p34_p0  ;;  %p729_p6 = por %p41_p4, %p40_p3 }
   0xc   : > { %p132_p7 = scmp.eq.s32.totalorder %s707_s19, 1  ;;  %p138_p8 = scmp.eq.s32.totalorder %s462_s20, 1 }
   0xd   : > { %s866_s26 = scalar_select %p729_p6, 1, 0 }
   0xe   : > { %p516_p10 = scmp.lt.s32.totalorder %s653_s18, 2  ;;  %p736_p11 = por %p132_p7, %p34_p0 }
   0xf   : > { %p740_p12 = por %p138_p8, %p40_p3  ;;  %s164_s29 = sand.u32 1, %s649_s17  }
  0x10   : > { %s867_s27 = scalar_select %p736_p11, 1, 0 }
  0x11   : > { %s868_s28 = scalar_select %p740_p12, 1, 0 }
  0x12   : > { %s466_s30 = sshll.u32 %s653_s18, 7  ;;  %s465_s5 = sshll.u32 %s164_s29, 6 }
  0x13   : > { %s749_s8 = scalar_lea.hbm %s858_s0, %s466_s30  ;;  %s168_s9 = scalar_lea.vmem [#allocation2], %s465_s5 }
  0x14   : > { %s174_s10 = sshll.u32 %s168_s9, 4  ;;  %p753_p13 = pnand %p516_p10, %p725_p5  ;;  %s757_s10 = int_to_ptr.vmem [resolvable:$true] %s174_s10 }
  0x15   : > { %s760_s12 = scalar_lea.sflag [#allocation3], %s164_s29  ;;  %s561_s13 = scalar_lea.hbm %s749_s8, 1024 }
  0x16   : > { %p562_p1 = scmp.ne.s32.totalorder %s749_s8, %s561_s13  ;;  %p563_p2 = pneg %p753_p13 }
  0x17   : > { %s566_s22 = scalar_lea.hbm %s858_s0, 2048  ;;  %p567_p5 = scmp.lt.s32.totalorder %s749_s8, %s858_s0 }
  0x18   : > { %p564_p3 = pnand %p563_p2, %p562_p1  ;;  %p568_p7 = scmp.lt.s32.totalorder %s566_s22, %s561_s13 }
  0x1a   : > { %p565_p4 = pneg %p564_p3  ;;  %p569_p8 = por %p568_p7, %p567_p5 }
  0x1c   : > { %p570_p10 = pnand %p569_p8, %p565_p4 }
  0x1e   : > { %573 = shalt.err (!%p570_p10)
}
  0x1f   : > { %s574_s29 = scalar_lea.vmem %s757_s10, 1024  ;;  %s655_s30 = smov [#allocation2]  }
  0x20   : > { %p575_p9 = scmp.ne.s32.totalorder %s757_s10, %s574_s29  ;;  %s579_s5 = sshll.u32 %s655_s30, 4  ;;  %s580_s5 = int_to_ptr.vmem [resolvable:$false] %s579_s5 }
  0x21   : > { %s581_s6 = scalar_lea.vmem %s580_s5, 2048  ;;  %p582_p3 = scmp.lt.s32.totalorder %s757_s10, %s580_s5 }
  0x22   : > { %p577_p0 = pnand %p575_p9, %p563_p2  ;;  %p583_p12 = scmp.lt.s32.totalorder %s581_s6, %s574_s29 }
  0x24   : > { %p578_p1 = pneg %p577_p0  ;;  %p584_p11 = por %p583_p12, %p582_p3 }
  0x26   : > { %p585_p6 = pnand %p584_p11, %p578_p1 }
  0x28   : > { %588 = shalt.err (!%p585_p6)
}
  0x29   : > { %s656_s7 = smov 256   ;;  %s657_s9 = smov 128  }
  0x2a   : > { %s658_s13 = smov 8   ;;  %p188_p9 = scmp.lt.s32.totalorder %s653_s18, 3 }
  0x2b   : > { %511 = dma.hbm_to_vmem [thread:$0]  (!%p753_p13), %s749_s8, 1024, %s757_s10, %s760_s12, %s656_s7, %s657_s9, %s658_s13  }
  0x2c   : > { %p870_p0 = scmp.ge.s32.totalorder %s653_s18, 1 }
  0x2e   : > { %p189_p2 = pnand %p870_p0, %p188_p9 }
  0x2f   : > { %s785_s14 = sand.u32 (!%p189_p2), 1, %s645_s16   ;;  %p871_p6 = scmp.ne.s32.totalorder (!%p189_p2), %s866_s26, 0 }
  0x30   : > { %192 = sbr.rel (%p189_p2) target bundleno = 344 (0x158), region = 36  ;;  %s468_s20 = sshll.u32 (!%p189_p2), %s785_s14, 6 }
  0x31   : > { %s195_s22 = scalar_lea.sflag (!%p189_p2), [#allocation3], %s785_s14  ;;  %s789_s23 = scalar_lea.vmem (!%p189_p2), [#allocation2], %s468_s20 }
  0x35   : > { %632 = dma.done.wait (%p871_p6), %s195_s22, 1024  }
  0x36   : > { %634 = vsyncadd (%p871_p6), %s195_s22, 4294966272  ;;  %v659_v0 = vmov 0   ;;  %v237_v1 = vld [vmem:[%s789_s23 + $0x38] sm:$0xff]  ;;  %v236_v2 = vld [vmem:[%s789_s23 + $0x30] sm:$0xff]  ;;  %vm250_vm0 = vcmask 523264   ;;  %p225_p11 = scmp.lt.s32.totalorder %s707_s19, 1  ;;  %v352_v30 = vlaneseq }
  0x37   : > { %554 = vset.pattern.permute.xlu0 %v659_v0  ;;  %485 = vmatprep.subr.mxu0 %v237_v1  ;;  %v235_v3 = vld [vmem:[%s789_s23 + $0x28] sm:$0xff]  ;;  %v228_v4 = vld [vmem:[%s859_s1] sm:$0xff]  ;;  %v233_v8 = vld [vmem:[%s789_s23 + $0x18] sm:$0xff]  ;;  %s472_s13 = sshll.u32 %s707_s19, 4  ;;  %s224_s20 = scalar_lea.vmem [#allocation5], %s785_s14 }
  0x38   : > { %486 = vmatpush3.msra.mxu0 %v237_v1  ;;  %501 = vmatprep.mubr.msk.f32.mxu0 %vm250_vm0, %v228_v4  ;;  %v238_v5 = vld [vmem:[%s860_s2] sm:$0xff]  ;;  %v239_v7 = vld [vmem:[%s860_s2 + $0x8] sm:$0xff]  ;;  %v232_v9 = vld [vmem:[%s789_s23 + $0x10] sm:$0xff]  ;;  %s226_s5 = scalar_select %p225_p11, %s707_s19, 1  ;;  %v353_v31 = vshrl.u32 %v352_v30, 7 }
  0x39   : > { %487 = vmatprep.subr.mxu0 %v236_v2  ;;  %v234_v6 = vld [vmem:[%s789_s23 + $0x20] sm:$0xff]  ;;  %242 = vperm.xlu0 %554, %v238_v5   ;;  %v231_v10 = vld [vmem:[%s789_s23 + $0x8] sm:$0xff]  ;;  %s387_s22 = sshll.u32 %s224_s20, 4  ;;  %s385_s10 = scalar_lea.hbm %s862_s4, %s472_s13  ;;  %s388_s22 = int_to_ptr.vmem [resolvable:$true] %s387_s22 }
  0x3a   : > { %488 = vmatpush3.msra.mxu0 %v236_v2  ;;  %v230_v11 = vld [vmem:[%s789_s23] sm:$0xff]  ;;  %v229_v12 = vld [vmem:[%s859_s1 + $0x8] sm:$0xff]  ;;  %s227_s9 = scalar_lea.vmem %s861_s3, %s226_s5  ;;  %v354_v33 = vadd.s32 8, %v353_v31  ;;  %s375_s26 = scalar_lea.sflag [#allocation4], %s785_s14 }
  0x3b   : > { %489 = vmatprep.subr.mxu0 %v235_v3  ;;  %v471_v32 = vld [vmem:[%s227_s9] ss:$0 sm:$0xff]  ;;  %s589_s11 = scalar_lea.vmem %s388_s22, 16  ;;  %p872_p13 = scmp.ne.s32.totalorder %s867_s27, 0 }
  0x3c   : > { %490 = vmatpush3.msra.mxu0 %v235_v3  ;;  %vm360_vm1 = vcmp.eq.s32.totalorder %v353_v31, %v471_v32  ;;  %vm361_vm2 = vcmp.eq.s32.totalorder %v354_v33, %v471_v32  ;;  %p590_p12 = scmp.ne.s32.totalorder %s388_s22, %s589_s11  ;;  %s660_s12 = smov [#allocation5]  }
  0x3d   : > { %491 = vmatprep.subr.mxu0 %v234_v6  ;;  %247 = vperm.xlu0 %554, %v239_v7   ;;  %s593_s25 = sshll.u32 %s660_s12, 4  ;;  %s594_s25 = int_to_ptr.vmem [resolvable:$false] %s593_s25 }
  0x3e   : > { %492 = vmatpush3.msra.mxu0 %v234_v6  ;;  %p591_p4 = pnand %p590_p12, %p872_p13  ;;  %s595_s19 = scalar_lea.vmem %s594_s25, 32 }
  0x3f   : > { %493 = vmatprep.subr.mxu0 %v233_v8  ;;  %p596_p7 = scmp.lt.s32.totalorder %s388_s22, %s594_s25  ;;  %p597_p8 = scmp.lt.s32.totalorder %s595_s19, %s589_s11 }
  0x40   : > { %494 = vmatpush3.msra.mxu0 %v233_v8  ;;  %p592_p5 = pneg %p591_p4 }
  0x41   : > { %495 = vmatprep.subr.mxu0 %v232_v9  ;;  %p598_p10 = por %p597_p8, %p596_p7 }
  0x42   : > { %496 = vmatpush3.msra.mxu0 %v232_v9 }
  0x43   : > { %497 = vmatprep.subr.mxu0 %v231_v10  ;;  %p599_p1 = pnand %p598_p10, %p592_p5 }
  0x44   : > { %498 = vmatpush3.msra.mxu0 %v231_v10 }
  0x45   : > { %499 = vmatprep.subr.mxu0 %v230_v11 }
  0x46   : > { %500 = vmatpush3.msra.mxu0 %v230_v11 }
  0x47   : > { %502 = vmatmul.mubr.msk.f32.vlgmr.msra.gmra.mxu0 %vm250_vm0, %v229_v12 }
  0xb4   : > { %v243_v13 = vpop.permute.xlu0 %242 }
  0xb8   : > { %v248_v15 = vpop.permute.xlu0 %247 }
 0x107   : > { %v503_v14 = vpop.f32.mrf.mxu0 }
 0x108   : > { %v329_v17 = vadd.f32 %v503_v14, %v248_v15 }
 0x109   : > { %v323_v16 = vpop.f32.mrf.mxu0 }
 0x10a   : > { %v324_v18 = vadd.f32 %v323_v16, %v243_v13 }
 0x10c   : > { %v332_v19 = vmax.f32 %v324_v18, %v329_v17 }
 0x10e   : > { %v333_v20 = vrot.slane %v332_v19, 4 }
 0x110   : > { %v334_v21 = vmax.f32 %v332_v19, %v333_v20 }
 0x112   : > { %v335_v22 = vrot.slane %v334_v21, 2 }
 0x114   : > { %v336_v23 = vmax.f32 %v334_v21, %v335_v22 }
 0x116   : > { %v337_v24 = vrot.slane %v336_v23, 1 }
 0x118   : > { %v338_v25 = vmax.f32 %v336_v23, %v337_v24 }
 0x11a   : > { %v339_v26 = vsub.f32 %v324_v18, %v338_v25  ;;  %v340_v27 = vsub.f32 %v329_v17, %v338_v25 }
 0x11c   : > { %v341_v28 = vmul.f32 1.442695, %v339_v26  ;;  %v343_v29 = vmul.f32 1.442695, %v340_v27 }
 0x11e   : > { %555 = vpow2.f32 %v341_v28 }
 0x11f   : > { %557 = vpow2.f32 %v343_v29 }
 0x12b   : > { %v556_v34 = vpop.eup %555 }
 0x12c   : > { %v558_v35 = vpop.eup %557  ;;  %v362_v36 = vsel %vm360_vm1, %v556_v34, 0.0 }
 0x12d   : > { %v345_v37 = vadd.f32 %v558_v35, %v556_v34  ;;  %v363_v38 = vsel %vm361_vm2, %v558_v35, 0.0 }
 0x12e   : > { %v364_v40 = vadd.f32 %v363_v38, %v362_v36 }
 0x12f   : > { %v346_v39 = vrot.slane %v345_v37, 4 }
 0x130   : > { %v365_v43 = vrot.slane %v364_v40, 4 }
 0x131   : > { %v347_v41 = vadd.f32 %v346_v39, %v345_v37 }
 0x132   : > { %v366_v46 = vadd.f32 %v365_v43, %v364_v40 }
 0x133   : > { %v348_v42 = vrot.slane %v347_v41, 2 }
 0x134   : > { %v367_v48 = vrot.slane %v366_v46, 2 }
 0x135   : > { %v349_v44 = vadd.f32 %v348_v42, %v347_v41 }
 0x136   : > { %v368_v49 = vadd.f32 %v367_v48, %v366_v46 }
 0x137   : > { %v350_v45 = vrot.slane %v349_v44, 1 }
 0x138   : > { %v369_v50 = vrot.slane %v368_v49, 1 }
 0x139   : > { %v351_v47 = vadd.f32 %v350_v45, %v349_v44 }
 0x13a   : > { %v370_v51 = vadd.f32 %v369_v50, %v368_v49 }
 0x13b   : > { %559 = vrcp.f32 %v351_v47 }
 0x148   : > { %v560_v52 = vpop.eup %559 }
 0x149   : > { %v372_v53 = vmul.f32 %v560_v52, %v370_v51 }
 0x14b   : > { %373 = vst [vmem:[%s224_s20] sm:$0x1] %v372_v53 }
 0x14c   : > { %602 = shalt.err (!%p599_p1)
}
 0x14d   : > { %s603_s29 = scalar_lea.hbm %s385_s10, 16  ;;  %s607_s5 = scalar_lea.hbm %s862_s4, 32 }
 0x14e   : > { %p604_p3 = scmp.ne.s32.totalorder %s385_s10, %s603_s29  ;;  %p608_p2 = scmp.lt.s32.totalorder %s385_s10, %s862_s4 }
 0x14f   : > { %p609_p6 = scmp.lt.s32.totalorder %s607_s5, %s603_s29 }
 0x150   : > { %p605_p9 = pnand %p604_p3, %p872_p13 }
 0x151   : > { %p610_p11 = por %p609_p6, %p608_p2 }
 0x152   : > { %p606_p0 = pneg %p605_p9 }
 0x154   : > { %p611_p12 = pnand %p610_p11, %p606_p0 }
 0x156   : > { %614 = shalt.err (!%p611_p12)
}
 0x157   : > { %506 = dma.vmem_to_hbm [thread:$0]  (%p872_p13), %s388_s22, 16, %s385_s10, %s375_s26  }
 0x158 PF: > { %s399_s9 = sand.u32 1, %s641_s15   ;;  %p873_p4 = scmp.ne.s32.totalorder %s868_s28, 0 }
 0x159   : > { %p874_p5 = scmp.ge.s32.totalorder %s653_s18, 2  ;;  %s400_s13 = scalar_lea.sflag [#allocation4], %s399_s9 }
 0x15b   : > { %p513_p7 = pnand %p874_p5, %p873_p4 }
 0x15d   : > { %p514_p8 = pneg %p513_p7 }
 0x15f   : > { %636 = dma.done.wait (%p514_p8), %s400_s13, 16  }
 0x160   : > { %638 = vsyncadd (%p514_p8), %s400_s13, 4294967280  ;;  %p17_p10 = scmp.ge.s32.totalorder %s711_s21, 4   ;;  %s875_s15 = smov %s645_s16 }
 0x161   : > { %s876_s16 = smov %s649_s17  ;;  %s877_s17 = smov %s723_s24 }
 0x162   : > { %s878_s18 = smov %s711_s21  ;;  %19 = sbr.rel (!%p17_p10) target bundleno = 5 (0x5), region = 84 }
 0x167   :  { %404 = vsyncpa [#allocation3], 1 }
 0x168   :  { %406 = vsyncpa [#allocation3 + $0x1], 1 }
 0x169   :  { %407 = vsyncpa [#allocation4], 1 }
 0x16a   :  { %409 = vsyncpa [#allocation4 + $0x1], 1 }

</bundles_post_ra>
